<compile_context>
chip_gen: v7x
topology: tpu7x:2x2x1
jax: 0.10.0
libtpu: 0.0.40
codegen_flags: <defaults>
</compile_context>

<pallas_src>
import jax
import jax.numpy as jnp
from jax.experimental import pallas as pl
from jax.experimental.pallas import tpu as pltpu


def _round_up(x: int, m: int) -> int:
    return ((x + m - 1) // m) * m


def value_embedding_kernel(x_ref, w_ref, b_ref, o_ref):
    # x_ref: (tm, seg_len), w_ref: (seg_len, d_model), b_ref: (1, d_model)
    y = jnp.dot(x_ref[...], w_ref[...], preferred_element_type=jnp.float32)
    y = y + b_ref[...].astype(jnp.float32)                 # bias broadcast
    o_ref[...] = jnp.maximum(y, 0.0).astype(o_ref.dtype)   # ReLU


def prepare_value_embedding_params(weight, bias):
    """One-time parameter prep (do NOT call per forward step).

    weight: (d_model, seg_len) PyTorch Linear layout; bias: (d_model,).
    Returns w_t: (seg_len, d_model), b2d: (1, d_model) — no lane padding, the
    kernel writes exactly d_model output columns.
    """
    return weight.T, bias.reshape(1, -1)


def _sublane(dtype) -> int:
    itemsize = jnp.dtype(dtype).itemsize
    return {4: 8, 2: 16, 1: 32}.get(itemsize, 8)


def _choose_tm(M: int, seg_len: int, d_model: int, dtype) -> int:
    """Row tile from a VMEM/DMA byte budget, not a fixed row cap."""
    itemsize = jnp.dtype(dtype).itemsize
    sublane = _sublane(dtype)
    # ~4 MiB of double-buffered (input + output) payload per grid step:
    # amortizes the ~0.35 us fixed per-step overhead, and stays well under the
    # default scoped VMEM on v5e (16 MiB), v6e (32 MiB) and v7x (32 MiB).
    budget = 4 << 20
    per_row = 2 * (seg_len + d_model) * itemsize
    tm = max(sublane, (budget // per_row) // sublane * sublane)
    # Aim for >= 2 grid steps so dimension_semantics=("parallel",) can split
    # rows across both v7x TensorCores; also never exceed the (padded) M.
    half = _round_up(max(1, pl.cdiv(M, 2)), sublane)
    tm = min(tm, half, _round_up(M, sublane))
    return max(sublane, tm)


def value_embedding(x, w_t, b2d, *, tm=None):
    """x: (batch, seg_num, seg_len); w_t/b2d from prepare_value_embedding_params."""
    batch, seg_num, seg_len = x.shape
    d_model = w_t.shape[1]
    M = batch * seg_num
    sublane = _sublane(x.dtype)

    if tm is None:
        tm = _choose_tm(M, seg_len, d_model, x.dtype)
    else:
        tm = max(sublane, _round_up(int(tm), sublane))
        tm = min(tm, _round_up(M, sublane))   # never ask for a block > array

    x2d = x.reshape(M, seg_len)               # free: leading-dim collapse
    grid = (pl.cdiv(M, tm),)                  # Pallas masks the partial tail

    out2d = pl.pallas_call(
        value_embedding_kernel,
        out_shape=jax.ShapeDtypeStruct((M, d_model), x.dtype),
        grid=grid,
        in_specs=[
            pl.BlockSpec((tm, seg_len), lambda i: (i, 0)),
            pl.BlockSpec((seg_len, d_model), lambda i: (0, 0)),   # resident W
            pl.BlockSpec((1, d_model), lambda i: (0, 0)),         # resident b
        ],
        out_specs=pl.BlockSpec((tm, d_model), lambda i: (i, 0)),
        compiler_params=pltpu.CompilerParams(
            dimension_semantics=("parallel",)),
    )(x2d, w_t, b2d)

    # Output is exactly (M, d_model): no row/column slice, reshape is free.
    return out2d.reshape(batch, seg_num, d_model)


def _reference(x, weight, bias):
    return jnp.maximum(jnp.einsum("bns,ds->bnd", x, weight) + bias, 0.0)


if __name__ == "__main__":
    # Small shapes consistent with SegRNN's ValueEmbedding usage.
    batch, seg_num, seg_len, d_model = 2, 8, 16, 32

    key = jax.random.PRNGKey(0)
    kx, kw, kb, kx2 = jax.random.split(key, 4)

    x = jax.random.normal(kx, (batch, seg_num, seg_len), dtype=jnp.float32)
    # Mimic PyTorch Linear's uniform(-1/sqrt(in), 1/sqrt(in)) init.
    bound = 1.0 / (seg_len ** 0.5)
    weight = jax.random.uniform(kw, (d_model, seg_len), minval=-bound,
                                maxval=bound, dtype=jnp.float32)
    bias = jax.random.uniform(kb, (d_model,), minval=-bound, maxval=bound,
                              dtype=jnp.float32)

    # One-time parameter prep (transpose hoisted out of the forward pass).
    w_t, b2d = prepare_value_embedding_params(weight, bias)

    out = jax.block_until_ready(value_embedding(x, w_t, b2d))
    ref = _reference(x, weight, bias)
    assert out.shape == (batch, seg_num, d_model)
    assert jnp.allclose(out, ref, atol=1e-5, rtol=1e-5)

    # Tail-block masking test: M = 15 rows with tm = 8 -> grid of 2 steps,
    # last block only 7 valid rows (per review: verify cdiv-grid tail writes).
    xb, sb = 3, 5
    x_tail = jax.random.normal(kx2, (xb, sb, seg_len), dtype=jnp.float32)
    out_tail = jax.block_until_ready(value_embedding(x_tail, w_t, b2d, tm=8))
    ref_tail = _reference(x_tail, weight, bias)
    assert out_tail.shape == (xb, sb, d_model)
    assert jnp.allclose(out_tail, ref_tail, atol=1e-5, rtol=1e-5)

    print("KERNEL_OK")
</pallas_src>

<mosaic_0001>
module attributes {stable_mosaic.version = 11 : i64} {
  func.func @value_embedding_kernel(%arg0: i32, %arg1: memref<8x16xf32, #tpu.memory_space<vmem>>, %arg2: memref<16x32xf32, #tpu.memory_space<vmem>>, %arg3: memref<1x32xf32, #tpu.memory_space<vmem>>, %arg4: memref<8x32xf32, #tpu.memory_space<vmem>>) attributes {dimension_semantics = [#tpu.dimension_semantics<parallel>], iteration_bounds = array<i64: 2>, scalar_prefetch = 0 : i64, scratch_operands = 0 : i64, tpu.core_type = #tpu.core_type<tc>, window_params = [{transform_indices = @transform_0, window_bounds = array<i64: 8, 16>}, {pipeline_mode = #tpu.pipeline_mode<synchronous>, transform_indices = @transform_1, window_bounds = array<i64: 16, 32>}, {pipeline_mode = #tpu.pipeline_mode<synchronous>, transform_indices = @transform_2, window_bounds = array<i64: 1, 32>}, {transform_indices = @transform_3, window_bounds = array<i64: 8, 32>}]} {
    %c0 = arith.constant 0 : index
    %c0_0 = arith.constant 0 : index
    %0 = vector.load %arg1[%c0, %c0_0] : memref<8x16xf32, #tpu.memory_space<vmem>>, vector<8x16xf32>
    %c0_1 = arith.constant 0 : index
    %c0_2 = arith.constant 0 : index
    %1 = vector.load %arg2[%c0_1, %c0_2] : memref<16x32xf32, #tpu.memory_space<vmem>>, vector<16x32xf32>
    %cst = arith.constant dense<0.000000e+00> : vector<8x32xf32>
    %2 = tpu.matmul %0, %1, %cst {dimension_numbers = #tpu.dot_dimension_numbers<[1], [0], [0], [1], [0, 0, 1, 1], [], []>} : vector<8x16xf32>, vector<16x32xf32>, vector<8x32xf32> -> vector<8x32xf32>
    %c0_3 = arith.constant 0 : index
    %c0_4 = arith.constant 0 : index
    %3 = vector.load %arg3[%c0_3, %c0_4] : memref<1x32xf32, #tpu.memory_space<vmem>>, vector<1x32xf32>
    %4 = vector.broadcast %3 : vector<1x32xf32> to vector<8x32xf32>
    %5 = arith.addf %2, %4 : vector<8x32xf32>
    %cst_5 = arith.constant 0.000000e+00 : f32
    %6 = vector.broadcast %cst_5 : f32 to vector<8x32xf32>
    %7 = arith.maximumf %5, %6 : vector<8x32xf32>
    %c0_6 = arith.constant 0 : index
    %c0_7 = arith.constant 0 : index
    %8 = vector.load %arg4[%c0_6, %c0_7] : memref<8x32xf32, #tpu.memory_space<vmem>>, vector<8x32xf32>
    tpu.vector_store %arg4[%c0_6, %c0_7], %7 {strides = array<i32>} : memref<8x32xf32, #tpu.memory_space<vmem>>, vector<8x32xf32>,
    return
  }
  func.func @transform_0(%arg0: i32) -> (i32, i32) {
    %c0_i32 = arith.constant 0 : i32
    %c0_i32_0 = arith.constant 0 : i32
    return %arg0, %c0_i32 : i32, i32
  }
  func.func @transform_1(%arg0: i32) -> (i32, i32) {
    %c0_i32 = arith.constant 0 : i32
    %c0_i32_0 = arith.constant 0 : i32
    %c0_i32_1 = arith.constant 0 : i32
    return %c0_i32, %c0_i32_0 : i32, i32
  }
  func.func @transform_2(%arg0: i32) -> (i32, i32) {
    %c0_i32 = arith.constant 0 : i32
    %c0_i32_0 = arith.constant 0 : i32
    %c0_i32_1 = arith.constant 0 : i32
    return %c0_i32, %c0_i32_0 : i32, i32
  }
  func.func @transform_3(%arg0: i32) -> (i32, i32) {
    %c0_i32 = arith.constant 0 : i32
    %c0_i32_0 = arith.constant 0 : i32
    return %arg0, %c0_i32 : i32, i32
  }
}

</mosaic_0001>

<bundles_post_ra>
// kernel: tpu_custom_call.1
= control target key start
LH: loop header
LB: loop body
LE: loop exit
PB: predicated region body
PF: predicated region fallthrough
CT: control target
= control target key end

     0   :  { %8 = vsyncpa [#allocation3], 0  ;;  %s830_s0 = inlined_call_operand.hbm [shape: f32[16,16], index: 0, kind: input, shape index: {}]   ;;  %s831_s1 = inlined_call_operand.hbm [shape: f32[16,32], index: 1, kind: input, shape index: {}]   ;;  %s832_s2 = inlined_call_operand.vmem [shape: f32[1,32], index: 2, kind: input, shape index: {}]   ;;  %s833_s3 = inlined_call_operand.hbm [shape: f32[16,32], index: 3, kind: output, shape index: {}]  }
   0x1   :  { %10 = vsyncpa [#allocation3 + $0x1], 0 }
   0x2   :  { %11 = vsyncpa [#allocation6], 0 }
   0x3   :  { %12 = vsyncpa [#allocation4], 0 }
   0x4   :  { %14 = vsyncpa [#allocation4 + $0x1], 0  ;;  %s631_s12 = smov 0   ;;  %s633_s13 = smov 0  }
   0x5   :  { %s635_s14 = smov 0   ;;  %s637_s15 = smov 0  }
   0x6 LB: > { %s652_s16 = sadd.s32 4294967295, %s601_s15   ;;  %s382_s17 = sadd.s32 4294967294, %s601_s15   ;;  %s601_s15 = sphi %s637_s15, %s853_s15   ;;  %s597_s14 = sphi %s635_s14, %s852_s14   ;;  %s593_s13 = sphi %s633_s13, %s851_s13   ;;  %s589_s12 = sphi %s631_s12, %s850_s12  }
   0x7   : > { %p40_p0 = scmp.ne.s32.totalorder %s593_s13, %s589_s12  ;;  %p834_p1 = scmp.eq.s32.totalorder %s652_s16, 0 }
   0x8   : > { %p112_p3 = scmp.eq.s32.totalorder %s382_s17, 1  ;;  %p383_p5 = scmp.ge.s32.totalorder %s601_s15, 1 }
   0x9   : > { %p661_p4 = por %p834_p1, %p40_p0  ;;  %p119_p7 = scmp.lt.s32.totalorder %s601_s15, 3 }
   0xa   : > { %p666_p6 = por %p112_p3, %p40_p0  ;;  %s603_s21 = smov [#allocation5]  }
   0xb   : > { %s837_s18 = scalar_select %p661_p4, 1, 0 }
   0xc   : > { %s838_s19 = scalar_select %p666_p6, 1, 0 }
   0xd   : > { %p671_p8 = pnand %p383_p5, %p119_p7  ;;  %s131_s22 = sshll.u32 %s603_s21, 4  ;;  %s675_s22 = int_to_ptr.vmem [resolvable:$true] %s131_s22 }
   0xe   : > { %s687_s24 = sadd.s32 1, %s601_s15   ;;  %s27_s25 = sadd.s32 1, %s597_s14 }
   0xf   : > { %s839_s20 = scalar_select %p671_p8, 1, 0 }
  0x10   : > { %p419_p9 = pneg %p671_p8  ;;  %s24_s26 = ssub.s32 %s601_s15, %s687_s24 }
  0x11   : > { %s473_s29 = scalar_lea.hbm %s831_s1, 256 }
  0x12   : > { %p682_p11 = pnand %p419_p9, %p834_p1  ;;  %p474_p12 = scmp.ne.s32.totalorder %s831_s1, %s473_s29 }
  0x13   : > { %p480_p5 = scmp.lt.u32.totalorder %s473_s29, %s831_s1 }
  0x14   : > { %p475_p13 = pneg %p682_p11 }
  0x16   : > { %p476_p0 = pnand %p475_p13, %p474_p12 }
  0x18   : > { %p477_p3 = pneg %p476_p0 }
  0x1a   : > { %p482_p7 = pnand %p480_p5, %p477_p3 }
  0x1c   : > { %485 = shalt.err (!%p482_p7)
}
  0x1d   : > { %s486_s7 = scalar_lea.vmem %s675_s22, 256  ;;  %p494_p2 = scmp.lt.s32.totalorder %s675_s22, %s675_s22 }
  0x1e   : > { %p487_p9 = scmp.ne.s32.totalorder %s675_s22, %s486_s7  ;;  %p495_p6 = scmp.lt.s32.totalorder %s486_s7, %s486_s7 }
  0x20   : > { %p489_p10 = pnand %p487_p9, %p475_p13  ;;  %p496_p4 = por %p495_p6, %p494_p2 }
  0x22   : > { %p490_p1 = pneg %p489_p10 }
  0x24   : > { %p497_p8 = pnand %p496_p4, %p490_p1 }
  0x26   : > { %500 = shalt.err (!%p497_p8)
}
  0x27   : > { %s604_s8 = smov 128   ;;  %s605_s9 = smov 8  }
  0x28   : > { %422 = dma.hbm_to_vmem [thread:$0]  (!%p682_p11), %s831_s1, 256, %s675_s22, [#allocation6], %s604_s8, %s604_s8, %s605_s9  }
  0x29   : > { %p25_p2 = scmp.eq.s32.totalorder %s24_s26, 0  ;;  %p34_p1 = scmp.ne.s32.totalorder %s597_s14, %s593_s13 }
  0x2a   : > { %p35_p4 = scmp.eq.s32.totalorder %s601_s15, 0  ;;  %p432_p6 = scmp.lt.s32.totalorder %s601_s15, 2 }
  0x2b   : > { %s718_s17 = scalar_select %p25_p2, %s597_s14, %s27_s25  }
  0x2c   : > { %p36_p8 = por %p35_p4, %p34_p1  ;;  %p841_p10 = scmp.eq.s32.totalorder %s652_s16, 1 }
  0x2d   : > { %s148_s27 = sand.u32 1, %s597_s14   ;;  %s387_s28 = sshll.u32 %s601_s15, 7 }
  0x2e   : > { %p722_p12 = por %p841_p10, %p34_p1  ;;  %s386_s29 = sshll.u32 %s148_s27, 3 }
  0x2f   : > { %s731_s4 = scalar_lea.hbm %s830_s0, %s387_s28  ;;  %s152_s22 = scalar_lea.vmem [#allocation2], %s386_s29 }
  0x30   : > { %s159_s25 = sshll.u32 %s152_s22, 4  ;;  %p733_p11 = pnand %p432_p6, %p36_p8  ;;  %s737_s25 = int_to_ptr.vmem [resolvable:$true] %s159_s25 }
  0x31   : > { %s149_s5 = scalar_lea.sflag [#allocation3], %s148_s27  ;;  %s501_s6 = scalar_lea.hbm %s731_s4, 128 }
  0x32   : > { %p502_p13 = scmp.ne.s32.totalorder %s731_s4, %s501_s6  ;;  %p503_p0 = pneg %p733_p11 }
  0x33   : > { %s506_s9 = scalar_lea.hbm %s830_s0, 256  ;;  %p507_p7 = scmp.lt.u32.totalorder %s731_s4, %s830_s0 }
  0x34   : > { %p504_p3 = pnand %p503_p0, %p502_p13  ;;  %p508_p9 = scmp.lt.u32.totalorder %s506_s9, %s501_s6 }
  0x35   : > { %p510_p1 = scmp.lt.u32.totalorder %s501_s6, %s731_s4 }
  0x36   : > { %p505_p5 = pneg %p504_p3  ;;  %p509_p2 = por %p508_p9, %p507_p7 }
  0x38   : > { %p511_p4 = por %p510_p1, %p509_p2 }
  0x3a   : > { %p512_p6 = pnand %p511_p4, %p505_p5 }
  0x3c   : > { %515 = shalt.err (!%p512_p6)
}
  0x3d   : > { %s516_s27 = scalar_lea.vmem %s737_s25, 128  ;;  %s606_s28 = smov [#allocation2]  }
  0x3e   : > { %p517_p8 = scmp.ne.s32.totalorder %s737_s25, %s516_s27  ;;  %s521_s29 = sshll.u32 %s606_s28, 4  ;;  %s522_s29 = int_to_ptr.vmem [resolvable:$false] %s521_s29 }
  0x3f   : > { %s523_s23 = scalar_lea.vmem %s522_s29, 256  ;;  %p524_p3 = scmp.lt.s32.totalorder %s737_s25, %s522_s29 }
  0x40   : > { %p519_p10 = pnand %p517_p8, %p503_p0  ;;  %p525_p7 = scmp.lt.s32.totalorder %s523_s23, %s516_s27 }
  0x42   : > { %p520_p13 = pneg %p519_p10  ;;  %p526_p9 = por %p525_p7, %p524_p3 }
  0x44   : > { %p527_p2 = pnand %p526_p9, %p520_p13 }
  0x46   : > { %530 = shalt.err (!%p527_p2)
}
  0x47   : > { %426 = dma.hbm_to_vmem [thread:$0]  (!%p733_p11), %s731_s4, 128, %s737_s25, %s149_s5  }
  0x48   : > { %p844_p5 = scmp.ne.s32.totalorder %s839_s20, 0 }
  0x49   : > { %s767_s30 = sand.u32 (!%p844_p5), 1, %s593_s13   ;;  %p845_p0 = scmp.ne.s32.totalorder (!%p844_p5), %s837_s18, 0 }
  0x4a   : > { %168 = sbr.rel (%p844_p5) target bundleno = 321 (0x141), region = 32  ;;  %s389_s22 = sshll.u32 (!%p844_p5), %s767_s30, 3 }
  0x4b   : > { %s171_s6 = scalar_lea.sflag (!%p844_p5), [#allocation3], %s767_s30  ;;  %s174_s7 = scalar_lea.vmem (!%p844_p5), [#allocation2], %s389_s22 }
  0x51   : > { %576 = dma.done.wait (%p845_p0), %s171_s6, 128  }
  0x52   : > { %578 = vsyncadd (%p845_p0), %s171_s6, 4294967168  ;;  %p846_p1 = scmp.eq.s32.totalorder %s652_s16, 0 }
  0x54   : > { %580 = dma.done.wait (%p846_p1), [#allocation6], 256   ;;  %p847_p11 = pmov %p846_p1 }
  0x55   : > { %v607_v0 = vmov 0.0|0.0   ;;  %vm608_vm0 = vmmov 0   ;;  %v609_v1 = vmov 0.0   ;;  %v202_v2 = vld [vmem:[#allocation5] sm:$0xff]  ;;  %v203_v3 = vld [vmem:[#allocation5 + $0x8] sm:$0xff]  ;;  %v201_v5 = vld [vmem:[%s174_s7] sm:$0xff] }
  0x56   : > { %582 = vsyncadd (%p847_p11), [#allocation6], 4294967040  ;;  %408 = vmatprep.subr.bf16.mxu0 %v607_v0  ;;  %405 = vmatprep.mubr.msk.f32.mxu0 %vm608_vm0, %v609_v1  ;;  %v409_v4 = vpack.c.bf16 %v203_v3, %v202_v2  ;;  %vm211_vm1 = vcmask 130048   ;;  %v392_v6 = vld [vmem:[%s832_s2] ss:$0 sm:$0xff]  ;;  %s395_s4 = sshll.u32 %s652_s16, 7 }
  0x57   : > { %s200_s25 = scalar_lea.vmem [#allocation7], %s389_s22  ;;  %vm286_vm2 = vcmask 261120   ;;  %s786_s9 = scalar_lea.hbm %s833_s3, %s395_s4 }
  0x58   : > { %410 = vmatpush3.bf16.msra.mxu0 %v409_v4  ;;  %s302_s26 = sshll.u32 %s200_s25, 4  ;;  %s289_s10 = scalar_lea.sflag [#allocation4], %s767_s30  ;;  %s788_s26 = int_to_ptr.vmem [resolvable:$true] %s302_s26 }
  0x59   : > { %s531_s11 = scalar_lea.vmem %s788_s26, 128  ;;  %s610_s16 = smov [#allocation7]  }
  0x5a   : > { %p532_p4 = scmp.ne.s32.totalorder %s788_s26, %s531_s11  ;;  %s535_s27 = sshll.u32 %s610_s16, 4  ;;  %s536_s27 = int_to_ptr.vmem [resolvable:$false] %s535_s27 }
  0x5b   : > { %406 = vmatmul.mubr.msk.f32.vlgmr.msra.gmra.mrb[0].mxu0 %vm211_vm1, %v201_v5  ;;  %s537_s28 = scalar_lea.vmem %s536_s27, 256  ;;  %p538_p10 = scmp.lt.s32.totalorder %s788_s26, %s536_s27 }
  0x5c   : > { %p533_p6 = pnand %p532_p4, %p722_p12  ;;  %p539_p13 = scmp.lt.s32.totalorder %s537_s28, %s531_s11 }
  0x5e   : > { %p534_p8 = pneg %p533_p6  ;;  %p540_p3 = por %p539_p13, %p538_p10 }
  0x60   : > { %p541_p7 = pnand %p540_p3, %p534_p8 }
 0x12e   : > { %v281_v7 = vpop.f32.mrb[0].mxu0 }
 0x12f   : > { %v282_v8 = vadd.f32 %v392_v6, %v281_v7  ;;  %v407_v9 = vpop.f32.mrb[1].mxu0 }
 0x131   : > { %v285_v10 = vmax.f32 %v282_v8, 0.0 }
 0x133   : > { %287 = vst.msk [vmem:[%s200_s25] sm:$0xff] %vm286_vm2, %v285_v10 }
 0x134   : > { %544 = shalt.err (!%p541_p7)
}
 0x135   : > { %s545_s29 = scalar_lea.hbm %s786_s9, 128  ;;  %s549_s22 = scalar_lea.hbm %s833_s3, 256 }
 0x136   : > { %p546_p9 = scmp.ne.s32.totalorder %s786_s9, %s545_s29  ;;  %p550_p0 = scmp.lt.u32.totalorder %s786_s9, %s833_s3 }
 0x137   : > { %p551_p1 = scmp.lt.u32.totalorder %s549_s22, %s545_s29  ;;  %p553_p4 = scmp.lt.u32.totalorder %s545_s29, %s786_s9 }
 0x138   : > { %p547_p2 = pnand %p546_p9, %p722_p12 }
 0x139   : > { %p552_p11 = por %p551_p1, %p550_p0 }
 0x13a   : > { %p548_p5 = pneg %p547_p2 }
 0x13b   : > { %p554_p6 = por %p553_p4, %p552_p11 }
 0x13d   : > { %p555_p8 = pnand %p554_p6, %p548_p5 }
 0x13f   : > { %558 = shalt.err (!%p555_p8)
}
 0x140   : > { %417 = dma.vmem_to_hbm [thread:$0]  (%p722_p12), %s788_s26, 128, %s786_s9, %s289_s10  }
 0x141 PF: > { %s314_s18 = sand.u32 1, %s589_s12   ;;  %p848_p10 = scmp.ne.s32.totalorder %s838_s19, 0 }
 0x142   : > { %p849_p13 = scmp.ge.s32.totalorder %s601_s15, 2  ;;  %s315_s20 = scalar_lea.sflag [#allocation4], %s314_s18 }
 0x144   : > { %p428_p3 = pnand %p849_p13, %p848_p10 }
 0x146   : > { %584 = dma.done.wait (!%p428_p3), %s315_s20, 128  }
 0x147   : > { %586 = vsyncadd (!%p428_p3), %s315_s20, 4294967168  ;;  %p17_p7 = scmp.ge.s32.totalorder %s687_s24, 4   ;;  %s850_s12 = smov %s593_s13 }
 0x148   : > { %s851_s13 = smov %s597_s14  ;;  %s852_s14 = smov %s718_s17 }
 0x149   : > { %s853_s15 = smov %s687_s24  ;;  %19 = sbr.rel (!%p17_p7) target bundleno = 6 (0x6), region = 81 }
 0x150   :  { %320 = vsyncpa [#allocation3], 1 }
 0x151   :  { %322 = vsyncpa [#allocation3 + $0x1], 1 }
 0x152   :  { %323 = vsyncpa [#allocation6], 1 }
 0x153   :  { %324 = vsyncpa [#allocation4], 1 }
 0x154   :  { %326 = vsyncpa [#allocation4 + $0x1], 1 }

</bundles_post_ra>
